<compile_context>
chip_gen: v7x
topology: tpu7x:2x2x1
jax: 0.10.0
libtpu: 0.0.40
codegen_flags: <defaults>
</compile_context>

<pallas_src>
import functools

import jax
import jax.numpy as jnp
from jax.experimental import pallas as pl
from jax.experimental.pallas import tpu as pltpu


def _round_up(v, m):
    return (v + m - 1) // m * m


def gin_kernel(a_ref, xk_ref, xi_ref, w1_ref, w2_ref, b2_ref, o_ref, acc_ref,
               *, bias_col):
    k = pl.program_id(1)
    nk = pl.num_programs(1)

    @pl.when(k == 0)
    def _():
        # GINConv with eps=0:  h = x + agg  ->  seed the accumulator with x's rows.
        acc_ref[...] = xi_ref[...]

    # Neighbor sum-aggregation tile: acc += A[i-block, k-block] @ x[k-block, :]
    a = a_ref[...].astype(jnp.float32)          # bf16 HBM storage, f32 compute
    acc_ref[...] += jnp.dot(a, xk_ref[...], preferred_element_type=jnp.float32)

    @pl.when(k == nk - 1)
    def _():
        h = acc_ref[...]
        # b1 is folded into row `bias_col` of the zero-padded W1: placing a 1.0
        # in that column of h makes  h @ W1_pad == h @ W1 + b1.
        col = jax.lax.broadcasted_iota(jnp.int32, h.shape, 1)
        h = jnp.where(col == bias_col, 1.0, h)
        h1 = jnp.maximum(
            jnp.dot(h, w1_ref[...], preferred_element_type=jnp.float32), 0.0)
        out = jnp.dot(h1, w2_ref[...], preferred_element_type=jnp.float32)
        out = out + b2_ref[...]
        o_ref[...] = out.astype(o_ref.dtype)


def gcn_forward(x, edge_index, w1, b1, w2, b2, *, tm=128, tk=128):
    """x: [N, C_in] float32, edge_index: [2, E] int32 (row0=src, row1=dst)."""
    n, c_in = x.shape
    hid = w2.shape[1]

    c_pad = _round_up(c_in + 1, 128)     # +1 column for the folded bias b1
    h_pad = _round_up(hid, 128)          # lane-dense hidden / output dim
    n_pad = _round_up(n, max(tm, tk))

    # ---- wrapper-side glue (not the hot path) ------------------------------
    src, dst = edge_index[0], edge_index[1]
    # Dense adjacency A[dst, src] += 1; small integer counts -> exact in bf16.
    adj = (jnp.zeros((n_pad, n_pad), jnp.float32)
           .at[dst, src].add(1.0)).astype(jnp.bfloat16)

    x_pad = jnp.zeros((n_pad, c_pad), jnp.float32).at[:n, :c_in].set(x)
    # W1 padded along K (b1 folded in at row c_in) and along N to h_pad.
    w1_pad = (jnp.zeros((c_pad, h_pad), jnp.float32)
              .at[:c_in, :hid].set(w1)
              .at[c_in, :hid].set(b1))
    w2_pad = jnp.zeros((h_pad, h_pad), jnp.float32).at[:hid, :hid].set(w2)
    b2_pad = jnp.zeros((1, h_pad), jnp.float32).at[0, :hid].set(b2)

    grid = (n_pad // tm, n_pad // tk)

    flops = (2 * n_pad * n_pad * c_pad          # A @ x
             + 2 * n_pad * c_pad * h_pad        # h @ W1
             + 2 * n_pad * h_pad * h_pad)       # h1 @ W2
    bytes_accessed = (adj.size * 2 + 2 * x_pad.size * 4
                      + (w1_pad.size + w2_pad.size + b2_pad.size) * 4
                      + n_pad * h_pad * 4)

    out_pad = pl.pallas_call(
        functools.partial(gin_kernel, bias_col=c_in),
        out_shape=jax.ShapeDtypeStruct((n_pad, h_pad), jnp.float32),
        grid_spec=pltpu.PrefetchScalarGridSpec(
            num_scalar_prefetch=0,
            grid=grid,
            in_specs=[
                pl.BlockSpec((tm, tk), lambda i, k: (i, k)),        # A tile
                pl.BlockSpec((tk, c_pad), lambda i, k: (k, 0)),     # x, K view
                pl.BlockSpec((tm, c_pad), lambda i, k: (i, 0)),     # x, row view
                pl.BlockSpec((c_pad, h_pad), lambda i, k: (0, 0)),  # W1 (+b1)
                pl.BlockSpec((h_pad, h_pad), lambda i, k: (0, 0)),  # W2
                pl.BlockSpec((1, h_pad), lambda i, k: (0, 0)),      # b2
            ],
            out_specs=pl.BlockSpec((tm, h_pad), lambda i, k: (i, 0)),
            scratch_shapes=[pltpu.VMEM((tm, c_pad), jnp.float32)],
        ),
        compiler_params=pltpu.CompilerParams(
            dimension_semantics=("parallel", "arbitrary")),
        cost_estimate=pl.CostEstimate(
            flops=flops, transcendentals=0, bytes_accessed=bytes_accessed),
    )(adj, x_pad, x_pad, w1_pad, w2_pad, b2_pad)

    return out_pad[:n, :hid]


def init_params(key, input_channels=65, hidden_channels=64):
    """Deterministic init matching torch.nn.Linear default (uniform +/- 1/sqrt(fan_in))."""
    k1, k2, k3, k4 = jax.random.split(key, 4)
    lim1 = 1.0 / jnp.sqrt(input_channels)
    lim2 = 1.0 / jnp.sqrt(hidden_channels)
    w1 = jax.random.uniform(k1, (input_channels, hidden_channels), jnp.float32, -lim1, lim1)
    b1 = jax.random.uniform(k2, (hidden_channels,), jnp.float32, -lim1, lim1)
    w2 = jax.random.uniform(k3, (hidden_channels, hidden_channels), jnp.float32, -lim2, lim2)
    b2 = jax.random.uniform(k4, (hidden_channels,), jnp.float32, -lim2, lim2)
    return w1, b1, w2, b2


def reference_forward(x, edge_index, w1, b1, w2, b2):
    src, dst = edge_index[0], edge_index[1]
    agg = jnp.zeros_like(x).at[dst].add(x[src])
    h = x + agg                                  # eps == 0
    h1 = jnp.maximum(h @ w1 + b1, 0.0)
    return h1 @ w2 + b2


if __name__ == "__main__":
    key = jax.random.PRNGKey(0)
    k_x, k_e, k_p = jax.random.split(key, 3)

    N, E = 8, 16                    # small graph: 8 nodes, 16 directed edges
    C_IN, HID = 65, 64              # module defaults

    x = jax.random.normal(k_x, (N, C_IN), jnp.float32)
    edge_index = jax.random.randint(k_e, (2, E), 0, N, jnp.int32)
    w1, b1, w2, b2 = init_params(k_p, C_IN, HID)

    out = gcn_forward(x, edge_index, w1, b1, w2, b2)
    out = jax.block_until_ready(out)

    ref = reference_forward(x, edge_index, w1, b1, w2, b2)
    assert out.shape == (N, HID), out.shape
    assert jnp.allclose(out, ref, atol=1e-4, rtol=1e-4), "mismatch vs reference"

    print("KERNEL_OK")
</pallas_src>

<mosaic_0001>
module attributes {stable_mosaic.version = 11 : i64} {
  func.func @gin_kernel(%arg0: i32, %arg1: i32, %arg2: memref<128x128xbf16, #tpu.memory_space<vmem>>, %arg3: memref<128x128xf32, #tpu.memory_space<vmem>>, %arg4: memref<128x128xf32, #tpu.memory_space<vmem>>, %arg5: memref<128x128xf32, #tpu.memory_space<vmem>>, %arg6: memref<128x128xf32, #tpu.memory_space<vmem>>, %arg7: memref<1x128xf32, #tpu.memory_space<vmem>>, %arg8: memref<128x128xf32, #tpu.memory_space<vmem>>, %arg9: memref<128x128xf32, #tpu.memory_space<vmem>>) attributes {dimension_semantics = [#tpu.dimension_semantics<parallel>, #tpu.dimension_semantics<arbitrary>], iteration_bounds = array<i64: 1, 1>, scalar_prefetch = 0 : i64, scratch_operands = 1 : i64, tpu.core_type = #tpu.core_type<tc>, window_params = [{transform_indices = @transform_0, window_bounds = array<i64: 128, 128>}, {transform_indices = @transform_1, window_bounds = array<i64: 128, 128>}, {transform_indices = @transform_2, window_bounds = array<i64: 128, 128>}, {pipeline_mode = #tpu.pipeline_mode<synchronous>, transform_indices = @transform_3, window_bounds = array<i64: 128, 128>}, {pipeline_mode = #tpu.pipeline_mode<synchronous>, transform_indices = @transform_4, window_bounds = array<i64: 128, 128>}, {pipeline_mode = #tpu.pipeline_mode<synchronous>, transform_indices = @transform_5, window_bounds = array<i64: 1, 128>}, {transform_indices = @transform_6, window_bounds = array<i64: 128, 128>}]} {
    %c0_i32 = arith.constant 0 : i32
    %0 = arith.cmpi eq, %arg1, %c0_i32 : i32
    %1 = arith.extui %0 : i1 to i32
    %c0_i32_0 = arith.constant 0 : i32
    %2 = arith.cmpi ne, %1, %c0_i32_0 : i32
    scf.if %2 {
      %c0_10 = arith.constant 0 : index
      %c0_11 = arith.constant 0 : index
      %13 = vector.load %arg4[%c0_10, %c0_11] : memref<128x128xf32, #tpu.memory_space<vmem>>, vector<128x128xf32>
      %c0_12 = arith.constant 0 : index
      %c0_13 = arith.constant 0 : index
      %14 = vector.load %arg9[%c0_12, %c0_13] : memref<128x128xf32, #tpu.memory_space<vmem>>, vector<128x128xf32>
      tpu.vector_store %arg9[%c0_12, %c0_13], %13 {strides = array<i32>} : memref<128x128xf32, #tpu.memory_space<vmem>>, vector<128x128xf32>,
    } else {
    }
    %c0 = arith.constant 0 : index
    %c0_1 = arith.constant 0 : index
    %3 = vector.load %arg2[%c0, %c0_1] : memref<128x128xbf16, #tpu.memory_space<vmem>>, vector<128x128xbf16>
    %4 = arith.extf %3 : vector<128x128xbf16> to vector<128x128xf32>
    %c0_2 = arith.constant 0 : index
    %c0_3 = arith.constant 0 : index
    %5 = vector.load %arg9[%c0_2, %c0_3] : memref<128x128xf32, #tpu.memory_space<vmem>>, vector<128x128xf32>
    %c0_4 = arith.constant 0 : index
    %c0_5 = arith.constant 0 : index
    %6 = vector.load %arg3[%c0_4, %c0_5] : memref<128x128xf32, #tpu.memory_space<vmem>>, vector<128x128xf32>
    %cst = arith.constant dense<0.000000e+00> : vector<128x128xf32>
    %7 = tpu.matmul %4, %6, %cst {dimension_numbers = #tpu.dot_dimension_numbers<[1], [0], [0], [1], [0, 0, 1, 1], [], []>} : vector<128x128xf32>, vector<128x128xf32>, vector<128x128xf32> -> vector<128x128xf32>
    %8 = arith.addf %5, %7 : vector<128x128xf32>
    %c0_6 = arith.constant 0 : index
    %c0_7 = arith.constant 0 : index
    %9 = vector.load %arg9[%c0_6, %c0_7] : memref<128x128xf32, #tpu.memory_space<vmem>>, vector<128x128xf32>
    tpu.vector_store %arg9[%c0_6, %c0_7], %8 {strides = array<i32>} : memref<128x128xf32, #tpu.memory_space<vmem>>, vector<128x128xf32>,
    %c0_i32_8 = arith.constant 0 : i32
    %10 = arith.cmpi eq, %arg1, %c0_i32_8 : i32
    %11 = arith.extui %10 : i1 to i32
    %c0_i32_9 = arith.constant 0 : i32
    %12 = arith.cmpi ne, %11, %c0_i32_9 : i32
    scf.if %12 {
      %c0_10 = arith.constant 0 : index
      %c0_11 = arith.constant 0 : index
      %13 = vector.load %arg9[%c0_10, %c0_11] : memref<128x128xf32, #tpu.memory_space<vmem>>, vector<128x128xf32>
      %14 = tpu.iota {dimensions = array<i32: 1>} : vector<128x128xi32>
      %c65_i32 = arith.constant 65 : i32
      %15 = vector.broadcast %c65_i32 : i32 to vector<128x128xi32>
      %16 = arith.cmpi eq, %14, %15 : vector<128x128xi32>
      %cst_12 = arith.constant 1.000000e+00 : f32
      %17 = vector.broadcast %cst_12 : f32 to vector<128x128xf32>
      %18 = arith.select %16, %17, %13 : vector<128x128xi1>, vector<128x128xf32>
      %c0_13 = arith.constant 0 : index
      %c0_14 = arith.constant 0 : index
      %19 = vector.load %arg5[%c0_13, %c0_14] : memref<128x128xf32, #tpu.memory_space<vmem>>, vector<128x128xf32>
      %cst_15 = arith.constant dense<0.000000e+00> : vector<128x128xf32>
      %20 = tpu.matmul %18, %19, %cst_15 {dimension_numbers = #tpu.dot_dimension_numbers<[1], [0], [0], [1], [0, 0, 1, 1], [], []>} : vector<128x128xf32>, vector<128x128xf32>, vector<128x128xf32> -> vector<128x128xf32>
      %cst_16 = arith.constant 0.000000e+00 : f32
      %21 = vector.broadcast %cst_16 : f32 to vector<128x128xf32>
      %22 = arith.maximumf %20, %21 : vector<128x128xf32>
      %c0_17 = arith.constant 0 : index
      %c0_18 = arith.constant 0 : index
      %23 = vector.load %arg6[%c0_17, %c0_18] : memref<128x128xf32, #tpu.memory_space<vmem>>, vector<128x128xf32>
      %cst_19 = arith.constant dense<0.000000e+00> : vector<128x128xf32>
      %24 = tpu.matmul %22, %23, %cst_19 {dimension_numbers = #tpu.dot_dimension_numbers<[1], [0], [0], [1], [0, 0, 1, 1], [], []>} : vector<128x128xf32>, vector<128x128xf32>, vector<128x128xf32> -> vector<128x128xf32>
      %c0_20 = arith.constant 0 : index
      %c0_21 = arith.constant 0 : index
      %25 = vector.load %arg7[%c0_20, %c0_21] : memref<1x128xf32, #tpu.memory_space<vmem>>, vector<1x128xf32>
      %26 = vector.broadcast %25 : vector<1x128xf32> to vector<128x128xf32>
      %27 = arith.addf %24, %26 : vector<128x128xf32>
      %c0_22 = arith.constant 0 : index
      %c0_23 = arith.constant 0 : index
      %28 = vector.load %arg8[%c0_22, %c0_23] : memref<128x128xf32, #tpu.memory_space<vmem>>, vector<128x128xf32>
      tpu.vector_store %arg8[%c0_22, %c0_23], %27 {strides = array<i32>} : memref<128x128xf32, #tpu.memory_space<vmem>>, vector<128x128xf32>,
    } else {
    }
    return
  }
  func.func @transform_0(%arg0: i32, %arg1: i32) -> (i32, i32) {
    %c0_i32 = arith.constant 0 : i32
    return %arg0, %arg1 : i32, i32
  }
  func.func @transform_1(%arg0: i32, %arg1: i32) -> (i32, i32) {
    %c0_i32 = arith.constant 0 : i32
    %c0_i32_0 = arith.constant 0 : i32
    return %arg1, %c0_i32 : i32, i32
  }
  func.func @transform_2(%arg0: i32, %arg1: i32) -> (i32, i32) {
    %c0_i32 = arith.constant 0 : i32
    %c0_i32_0 = arith.constant 0 : i32
    return %arg0, %c0_i32 : i32, i32
  }
  func.func @transform_3(%arg0: i32, %arg1: i32) -> (i32, i32) {
    %c0_i32 = arith.constant 0 : i32
    %c0_i32_0 = arith.constant 0 : i32
    %c0_i32_1 = arith.constant 0 : i32
    return %c0_i32, %c0_i32_0 : i32, i32
  }
  func.func @transform_4(%arg0: i32, %arg1: i32) -> (i32, i32) {
    %c0_i32 = arith.constant 0 : i32
    %c0_i32_0 = arith.constant 0 : i32
    %c0_i32_1 = arith.constant 0 : i32
    return %c0_i32, %c0_i32_0 : i32, i32
  }
  func.func @transform_5(%arg0: i32, %arg1: i32) -> (i32, i32) {
    %c0_i32 = arith.constant 0 : i32
    %c0_i32_0 = arith.constant 0 : i32
    %c0_i32_1 = arith.constant 0 : i32
    return %c0_i32, %c0_i32_0 : i32, i32
  }
  func.func @transform_6(%arg0: i32, %arg1: i32) -> (i32, i32) {
    %c0_i32 = arith.constant 0 : i32
    %c0_i32_0 = arith.constant 0 : i32
    return %arg0, %c0_i32 : i32, i32
  }
}

</mosaic_0001>

<bundles_post_ra>
// kernel: tpu_custom_call.1
= control target key start
LH: loop header
LB: loop body
LE: loop exit
PB: predicated region body
PF: predicated region fallthrough
CT: control target
= control target key end

     0   :  { %11 = vsyncpa [#allocation4], 0  ;;  %s1563_s0 = inlined_call_operand.hbm [shape: bf16[128,128], index: 0, kind: input, shape index: {}]   ;;  %s1564_s1 = inlined_call_operand.hbm [shape: f32[128,128], index: 1, kind: input, shape index: {}]   ;;  %s1565_s2 = inlined_call_operand.hbm [shape: f32[128,128], index: 2, kind: input, shape index: {}]   ;;  %s1566_s3 = inlined_call_operand.hbm [shape: f32[128,128], index: 3, kind: input, shape index: {}]   ;;  %s1567_s4 = inlined_call_operand.hbm [shape: f32[128,128], index: 4, kind: input, shape index: {}]   ;;  %s1568_s5 = inlined_call_operand.vmem [shape: f32[1,128], index: 5, kind: input, shape index: {}]   ;;  %s1569_s6 = inlined_call_operand.hbm [shape: f32[128,128], index: 6, kind: output, shape index: {}]  }
   0x1   :  { %12 = vsyncpa [#allocation7], 0 }
   0x2   :  { %13 = vsyncpa [#allocation10], 0 }
   0x3   :  { %14 = vsyncpa [#allocation5], 0  ;;  %s1353_s21 = smov [#allocation6]   ;;  %s1213_s25 = scalar_lea.hbm %s1564_s1, 2048 }
   0x4   :  { %s32_s22 = sshll.u32 %s1353_s21, 4  ;;  %p1214_p0 = scmp.ne.s32.totalorder %s1564_s1, %s1213_s25  ;;  %s33_s22 = int_to_ptr.vmem [resolvable:$true] %s32_s22 }
   0x5   :  { %p1217_p1 = scmp.lt.u32.totalorder %s1213_s25, %s1564_s1 }
   0x7   :  { %p1219_p2 = pnand %p1217_p1, %p1214_p0 }
   0x9   :  { %1222 = shalt.err (!%p1219_p2)
}
   0xa   :  { %s1223_s30 = scalar_lea.vmem %s33_s22, 2048  ;;  %p1228_p4 = scmp.lt.s32.totalorder %s33_s22, %s33_s22 }
   0xb   :  { %p1224_p3 = scmp.ne.s32.totalorder %s33_s22, %s1223_s30  ;;  %p1229_p5 = scmp.lt.s32.totalorder %s1223_s30, %s1223_s30 }
   0xd   :  { %p1230_p6 = por %p1229_p5, %p1228_p4 }
   0xf   :  { %p1231_p7 = pnand %p1230_p6, %p1224_p3 }
  0x11   :  { %1234 = shalt.err (!%p1231_p7)
}
  0x12   :  { %s1354_s7 = smov 128   ;;  %s1355_s8 = smov 8  }
  0x13   :  { %38 = dma.hbm_to_vmem [thread:$0]  %s1564_s1, 2048, %s33_s22, [#allocation7], %s1354_s7, %s1354_s7, %s1355_s8  }
  0x14   :  { %s1356_s11 = smov [#allocation9]   ;;  %s1357_s13 = smov [#allocation3]  }
  0x15   :  { %s56_s12 = sshll.u32 %s1356_s11, 4  ;;  %s20_s14 = sshll.u32 %s1357_s13, 4  ;;  %s57_s12 = int_to_ptr.vmem [resolvable:$true] %s56_s12  ;;  %s21_s14 = int_to_ptr.vmem [resolvable:$true] %s20_s14 }
  0x16   :  { %s1235_s17 = scalar_lea.hbm %s1566_s3, 2048 }
  0x17   :  { %p1236_p8 = scmp.ne.s32.totalorder %s1566_s3, %s1235_s17  ;;  %p1239_p9 = scmp.lt.u32.totalorder %s1235_s17, %s1566_s3 }
  0x19   :  { %p1241_p10 = pnand %p1239_p9, %p1236_p8 }
  0x1b   :  { %1244 = shalt.err (!%p1241_p10)
}
  0x1c   :  { %s1245_s1 = scalar_lea.vmem %s57_s12, 2048  ;;  %p1250_p12 = scmp.lt.s32.totalorder %s57_s12, %s57_s12 }
  0x1d   :  { %p1246_p11 = scmp.ne.s32.totalorder %s57_s12, %s1245_s1  ;;  %p1251_p13 = scmp.lt.s32.totalorder %s1245_s1, %s1245_s1 }
  0x1f   :  { %p1252_p0 = por %p1251_p13, %p1250_p12 }
  0x21   :  { %p1253_p1 = pnand %p1252_p0, %p1246_p11 }
  0x23   :  { %1256 = shalt.err (!%p1253_p1)
}
  0x24   :  { %62 = dma.hbm_to_vmem [thread:$0]  %s1566_s3, 2048, %s57_s12, [#allocation10], %s1354_s7, %s1354_s7, %s1355_s8  }
  0x25   :  { %s1257_s26 = scalar_lea.hbm %s1563_s0, 1024 }
  0x26   :  { %p1258_p2 = scmp.ne.s32.totalorder %s1563_s0, %s1257_s26  ;;  %p1261_p3 = scmp.lt.u32.totalorder %s1257_s26, %s1563_s0 }
  0x28   :  { %p1263_p4 = pnand %p1261_p3, %p1258_p2 }
  0x2a   :  { %1266 = shalt.err (!%p1263_p4)
}
  0x2b   :  { %s1267_s9 = scalar_lea.vmem %s21_s14, 1024  ;;  %p1272_p6 = scmp.lt.s32.totalorder %s21_s14, %s21_s14 }
  0x2c   :  { %p1268_p5 = scmp.ne.s32.totalorder %s21_s14, %s1267_s9  ;;  %p1273_p7 = scmp.lt.s32.totalorder %s1267_s9, %s1267_s9 }
  0x2e   :  { %p1274_p8 = por %p1273_p7, %p1272_p6 }
  0x30   :  { %p1275_p9 = pnand %p1274_p8, %p1268_p5 }
  0x32   :  { %1278 = shalt.err (!%p1275_p9)
}
  0x33   :  { %s1358_s3 = smov 64   ;;  %s1359_s10 = smov 4  }
  0x34   :  { %26 = dma.hbm_to_vmem [thread:$0]  %s1563_s0, 1024, %s21_s14, [#allocation4], %s1358_s3, %s1358_s3, %s1359_s10  }
  0x35   :  { %s1360_s13 = smov [#allocation8]   ;;  %s1361_s16 = smov [#allocation11]  }
  0x36   :  { %s44_s15 = sshll.u32 %s1360_s13, 4  ;;  %s68_s17 = sshll.u32 %s1361_s16, 4  ;;  %s45_s15 = int_to_ptr.vmem [resolvable:$true] %s44_s15  ;;  %s69_s17 = int_to_ptr.vmem [resolvable:$true] %s68_s17 }
  0x37   :  { %s1279_s20 = scalar_lea.hbm %s1565_s2, 2048 }
  0x38   :  { %p1280_p10 = scmp.ne.s32.totalorder %s1565_s2, %s1279_s20  ;;  %p1283_p11 = scmp.lt.u32.totalorder %s1279_s20, %s1565_s2 }
  0x3a   :  { %p1285_p12 = pnand %p1283_p11, %p1280_p10 }
  0x3c   :  { %1288 = shalt.err (!%p1285_p12)
}
  0x3d   :  { %s1289_s0 = scalar_lea.vmem %s45_s15, 2048  ;;  %p1294_p0 = scmp.lt.s32.totalorder %s45_s15, %s45_s15 }
  0x3e   :  { %p1290_p13 = scmp.ne.s32.totalorder %s45_s15, %s1289_s0  ;;  %p1295_p1 = scmp.lt.s32.totalorder %s1289_s0, %s1289_s0 }
  0x40   :  { %p1296_p2 = por %p1295_p1, %p1294_p0 }
  0x42   :  { %p1297_p3 = pnand %p1296_p2, %p1290_p13 }
  0x44   :  { %1300 = shalt.err (!%p1297_p3)
}
  0x45   :  { %50 = dma.hbm_to_vmem [thread:$0]  %s1565_s2, 2048, %s45_s15, [#allocation7], %s1354_s7, %s1354_s7, %s1355_s8  }
  0x46   :  { %s1301_s27 = scalar_lea.hbm %s1567_s4, 2048 }
  0x47   :  { %p1302_p4 = scmp.ne.s32.totalorder %s1567_s4, %s1301_s27  ;;  %p1305_p5 = scmp.lt.u32.totalorder %s1301_s27, %s1567_s4 }
  0x49   :  { %p1307_p6 = pnand %p1305_p5, %p1302_p4 }
  0x4b   :  { %1310 = shalt.err (!%p1307_p6)
}
  0x4c   :  { %s1311_s3 = scalar_lea.vmem %s69_s17, 2048  ;;  %p1316_p8 = scmp.lt.s32.totalorder %s69_s17, %s69_s17 }
  0x4d   :  { %p1312_p7 = scmp.ne.s32.totalorder %s69_s17, %s1311_s3  ;;  %p1317_p9 = scmp.lt.s32.totalorder %s1311_s3, %s1311_s3 }
  0x4f   :  { %p1318_p10 = por %p1317_p9, %p1316_p8 }
  0x51   :  { %p1319_p11 = pnand %p1318_p10, %p1312_p7 }
  0x53   :  { %1322 = shalt.err (!%p1319_p11)
}
  0x54   :  { %74 = dma.hbm_to_vmem [thread:$0]  %s1567_s4, 2048, %s69_s17, [#allocation10], %s1354_s7, %s1354_s7, %s1355_s8  }
  0x55   :  { %1345 = dma.done.wait [#allocation4], 1024  }
  0x56   :  { %1346 = vsyncadd [#allocation4], 4294966272 }
  0x57   :  { %1347 = dma.done.wait [#allocation7], 4096  }
  0x58   :  { %1348 = vsyncadd [#allocation7], 4294963200 }
  0x59   :  { %1349 = dma.done.wait [#allocation10], 4096  }
  0x5a   :  { %1350 = vsyncadd [#allocation10], 4294963200  ;;  %v176_v0 = vld [vmem:[#allocation6] sm:$0xff]  ;;  %v177_v1 = vld [vmem:[#allocation6 + $0x8] sm:$0xff] }
  0x5b   :  { %v178_v2 = vld [vmem:[#allocation6 + $0x10] sm:$0xff]  ;;  %v1091_v3 = vpack.c.bf16 %v177_v1, %v176_v0  ;;  %v179_v4 = vld [vmem:[#allocation6 + $0x18] sm:$0xff]  ;;  %v180_v6 = vld [vmem:[#allocation6 + $0x20] sm:$0xff] }
  0x5c   :  { %v1095_v5 = vpack.c.bf16 %v179_v4, %v178_v2  ;;  %v181_v7 = vld [vmem:[#allocation6 + $0x28] sm:$0xff]  ;;  %v1470_v9 = vld [vmem:[#allocation3] sm:$0xff]   ;;  %v182_v10 = vld [vmem:[#allocation6 + $0x30] sm:$0xff] }
  0x5d   :  { %1092 = vmatprep.subr.bf16.mxu0 %v1091_v3  ;;  %v1099_v8 = vpack.c.bf16 %v181_v7, %v180_v6  ;;  %v183_v11 = vld [vmem:[#allocation6 + $0x38] sm:$0xff]  ;;  %v790_v12 = vunpack.c.l.bf16 %v1470_v9  ;;  %v407_v13 = vld [vmem:[#allocation9] sm:$0xff]  ;;  %v408_v14 = vld [vmem:[#allocation9 + $0x8] sm:$0xff]  ;;  %v791_v48 = vunpack.c.h.bf16 %v1470_v9 }
  0x5e   :  { %1094 = vmatpush3.bf16.msra.mxu0 %v1091_v3  ;;  %v409_v15 = vld [vmem:[#allocation9 + $0x10] sm:$0xff]  ;;  %v1103_v16 = vpack.c.bf16 %v183_v11, %v182_v10  ;;  %v410_v17 = vld [vmem:[#allocation9 + $0x18] sm:$0xff]  ;;  %v184_v18 = vld [vmem:[#allocation6 + $0x40] sm:$0xff]  ;;  %v1123_v20 = vpack.c.bf16 %v408_v14, %v407_v13 }
  0x5f   :  { %1096 = vmatprep.subr.bf16.mxu0 %v1095_v5  ;;  %955 = vmatprep.mubr.f32.mxu0 %v790_v12  ;;  %v185_v19 = vld [vmem:[#allocation6 + $0x48] sm:$0xff]  ;;  %v1127_v21 = vpack.c.bf16 %v410_v17, %v409_v15  ;;  %v411_v22 = vld [vmem:[#allocation9 + $0x20] sm:$0xff]  ;;  %v186_v25 = vld [vmem:[#allocation6 + $0x50] sm:$0xff] }
  0x60   :  { %v412_v23 = vld [vmem:[#allocation9 + $0x28] sm:$0xff]  ;;  %1124 = vmatprep.subr.bf16.mxu1 %v1123_v20  ;;  %v1107_v24 = vpack.c.bf16 %v185_v19, %v184_v18  ;;  %v187_v26 = vld [vmem:[#allocation6 + $0x58] sm:$0xff]  ;;  %v413_v28 = vld [vmem:[#allocation9 + $0x30] sm:$0xff] }
  0x61   :  { %1126 = vmatpush3.bf16.msra.mxu1 %v1123_v20  ;;  %v1131_v27 = vpack.c.bf16 %v412_v23, %v411_v22  ;;  %v414_v29 = vld [vmem:[#allocation9 + $0x38] sm:$0xff]  ;;  %v1111_v30 = vpack.c.bf16 %v187_v26, %v186_v25  ;;  %v188_v31 = vld [vmem:[#allocation6 + $0x60] sm:$0xff]  ;;  %v189_v32 = vld [vmem:[#allocation6 + $0x68] sm:$0xff] }
  0x62   :  { %1098 = vmatpush3.bf16.msra.mxu0 %v1095_v5  ;;  %1128 = vmatprep.subr.bf16.mxu1 %v1127_v21  ;;  %v1135_v33 = vpack.c.bf16 %v414_v29, %v413_v28  ;;  %v415_v34 = vld [vmem:[#allocation9 + $0x40] sm:$0xff]  ;;  %v416_v35 = vld [vmem:[#allocation9 + $0x48] sm:$0xff]  ;;  %v1115_v36 = vpack.c.bf16 %v189_v32, %v188_v31  ;;  %v190_v37 = vld [vmem:[#allocation6 + $0x70] sm:$0xff]  ;;  %v388_v29 = vlaneseq }
  0x63   :  { %1100 = vmatprep.subr.bf16.mxu0 %v1099_v8  ;;  %v191_v38 = vld [vmem:[#allocation6 + $0x78] sm:$0xff]  ;;  %v1139_v39 = vpack.c.bf16 %v416_v35, %v415_v34  ;;  %v417_v40 = vld [vmem:[#allocation9 + $0x50] sm:$0xff]  ;;  %v419_v44 = vld [vmem:[#allocation9 + $0x60] sm:$0xff] }
  0x64   :  { %v418_v41 = vld [vmem:[#allocation9 + $0x58] sm:$0xff]  ;;  %v1119_v42 = vpack.c.bf16 %v191_v38, %v190_v37  ;;  %v420_v45 = vld [vmem:[#allocation9 + $0x68] sm:$0xff]  ;;  %v821_v50 = vld [vmem:[#allocation3 + $0x10] sm:$0xff]  }
  0x65   :  { %1130 = vmatpush3.bf16.msra.mxu1 %v1127_v21  ;;  %v1143_v43 = vpack.c.bf16 %v418_v41, %v417_v40  ;;  %v820_v46 = vld [vmem:[#allocation3 + $0x8] sm:$0xff]   ;;  %v1147_v47 = vpack.c.bf16 %v420_v45, %v419_v44  ;;  %v798_v52 = vunpack.c.l.bf16 %v821_v50  ;;  %v822_v53 = vld [vmem:[#allocation3 + $0x18] sm:$0xff]   ;;  %v799_v54 = vunpack.c.h.bf16 %v821_v50  ;;  %v823_v56 = vld [vmem:[#allocation3 + $0x20] sm:$0xff]  }
  0x66   :  { %1102 = vmatpush3.bf16.msra.mxu0 %v1099_v8  ;;  %1132 = vmatprep.subr.bf16.mxu1 %v1131_v27  ;;  %v794_v49 = vunpack.c.l.bf16 %v820_v46  ;;  %v795_v51 = vunpack.c.h.bf16 %v820_v46  ;;  %v802_v55 = vunpack.c.l.bf16 %v822_v53  ;;  %v803_v57 = vunpack.c.h.bf16 %v822_v53  ;;  %v824_v59 = vld [vmem:[#allocation3 + $0x28] sm:$0xff]   ;;  %v825_v62 = vld [vmem:[#allocation3 + $0x30] sm:$0xff]   ;;  %v826_v1 = vld [vmem:[#allocation3 + $0x38] sm:$0xff]  }
  0x67   :  { %1104 = vmatprep.subr.bf16.mxu0 %v1103_v16  ;;  %v806_v58 = vunpack.c.l.bf16 %v823_v56  ;;  %v807_v60 = vunpack.c.h.bf16 %v823_v56  ;;  %v810_v61 = vunpack.c.l.bf16 %v824_v59  ;;  %v811_v63 = vunpack.c.h.bf16 %v824_v59  ;;  %v421_v5 = vld [vmem:[#allocation9 + $0x70] sm:$0xff]  ;;  %v422_v6 = vld [vmem:[#allocation9 + $0x78] sm:$0xff]  ;;  %v584_v8 = vld [vmem:[#allocation11] sm:$0xff] }
  0x68   :  { %v814_v0 = vunpack.c.l.bf16 %v825_v62  ;;  %v815_v2 = vunpack.c.h.bf16 %v825_v62  ;;  %v818_v3 = vunpack.c.l.bf16 %v826_v1  ;;  %v819_v4 = vunpack.c.h.bf16 %v826_v1  ;;  %v585_v9 = vld [vmem:[#allocation11 + $0x8] sm:$0xff]  ;;  %v586_v10 = vld [vmem:[#allocation11 + $0x10] sm:$0xff]  ;;  %v587_v12 = vld [vmem:[#allocation11 + $0x18] sm:$0xff] }
  0x69   :  { %1134 = vmatpush3.bf16.msra.mxu1 %v1131_v27  ;;  %v1151_v7 = vpack.c.bf16 %v422_v6, %v421_v5  ;;  %v1155_v11 = vpack.c.bf16 %v585_v9, %v584_v8  ;;  %v1474_v13 = vpack.c.bf16 %v587_v12, %v586_v10  ;;  %v588_v14 = vld [vmem:[#allocation11 + $0x20] sm:$0xff]  ;;  %v589_v15 = vld [vmem:[#allocation11 + $0x28] sm:$0xff]  ;;  %v590_v17 = vld [vmem:[#allocation11 + $0x30] sm:$0xff] }
  0x6a   :  { %1106 = vmatpush3.bf16.msra.mxu0 %v1103_v16  ;;  %1136 = vmatprep.subr.bf16.mxu1 %v1135_v33  ;;  %v1477_v16 = vpack.c.bf16 %v589_v15, %v588_v14  ;;  %v591_v18 = vld [vmem:[#allocation11 + $0x38] sm:$0xff]  ;;  %v592_v20 = vld [vmem:[#allocation11 + $0x40] sm:$0xff]  ;;  %v593_v21 = vld [vmem:[#allocation11 + $0x48] sm:$0xff] }
  0x6b   :  { %1108 = vmatprep.subr.bf16.mxu0 %v1107_v24  ;;  %v1481_v19 = vpack.c.bf16 %v591_v18, %v590_v17  ;;  %v1485_v22 = vpack.c.bf16 %v593_v21, %v592_v20  ;;  %v594_v23 = vld [vmem:[#allocation11 + $0x50] sm:$0xff]  ;;  %v596_v26 = vld [vmem:[#allocation11 + $0x60] sm:$0xff]  ;;  %v597_v27 = vld [vmem:[#allocation11 + $0x68] sm:$0xff] }
  0x6c   :  { %v1493_v28 = vpack.c.bf16 %v597_v27, %v596_v26  ;;  %v97_v31 = vld [vmem:[#allocation8 + $0x8] sm:$0xff]  ;;  %v96_v32 = vld [vmem:[#allocation8] sm:$0xff]  ;;  %v99_v37 = vld [vmem:[#allocation8 + $0x18] sm:$0xff] }
  0x6d   :  { %1138 = vmatpush3.bf16.msra.mxu1 %v1135_v33  ;;  %v98_v38 = vld [vmem:[#allocation8 + $0x10] sm:$0xff]  ;;  %v101_v45 = vld [vmem:[#allocation8 + $0x28] sm:$0xff]  ;;  %v100_v46 = vld [vmem:[#allocation8 + $0x20] sm:$0xff] }
  0x6e   :  { %1110 = vmatpush3.bf16.msra.mxu0 %v1107_v24  ;;  %1140 = vmatprep.subr.bf16.mxu1 %v1139_v39  ;;  %v595_v24 = vld [vmem:[#allocation11 + $0x58] sm:$0xff]  ;;  %v104_v62 = vld [vmem:[#allocation8 + $0x40] sm:$0xff]  ;;  %v106_v6 = vld [vmem:[#allocation8 + $0x50] sm:$0xff] }
  0x6f   :  { %1112 = vmatprep.subr.bf16.mxu0 %v1111_v30  ;;  %v1489_v25 = vpack.c.bf16 %v595_v24, %v594_v23  ;;  %v103_v53 = vld [vmem:[#allocation8 + $0x38] sm:$0xff]  ;;  %v108_v14 = vld [vmem:[#allocation8 + $0x60] sm:$0xff]  ;;  %v110_v23 = vld [vmem:[#allocation8 + $0x70] sm:$0xff] }
  0x70   :  { %v107_v5 = vld [vmem:[#allocation8 + $0x58] sm:$0xff] }
  0x71   :  { %1142 = vmatpush3.bf16.msra.mxu1 %v1139_v39  ;;  %v111_v21 = vld [vmem:[#allocation8 + $0x78] sm:$0xff] }
  0x72   :  { %1114 = vmatpush3.bf16.msra.mxu0 %v1111_v30  ;;  %1144 = vmatprep.subr.bf16.mxu1 %v1143_v43  ;;  %v1498_v30 = vand.u32 127, %v388_v29 }
  0x73   :  { %1116 = vmatprep.subr.bf16.mxu0 %v1115_v36 }
  0x74   :  { %vm390_vm0 = vcmp.eq.s32.totalorder %v1498_v30, 65 }
  0x75   :  { %1146 = vmatpush3.bf16.msra.mxu1 %v1143_v43 }
  0x76   :  { %1118 = vmatpush3.bf16.msra.mxu0 %v1115_v36  ;;  %1148 = vmatprep.subr.bf16.mxu1 %v1147_v47 }
  0x77   :  { %1120 = vmatprep.subr.bf16.mxu0 %v1119_v42 }
  0x79   :  { %1150 = vmatpush3.bf16.msra.mxu1 %v1147_v47 }
  0x7a   :  { %1122 = vmatpush3.bf16.msra.mxu0 %v1119_v42  ;;  %1152 = vmatprep.subr.bf16.mxu1 %v1151_v7 }
  0x7b   :  { %1156 = vmatprep.subr.bf16.mxu0 %v1155_v11 }
  0x7d   :  { %956 = vmatmul.mubr.f32.vlgmr.msra.gmra.mrb[0].mxu0 %v791_v48  ;;  %1154 = vmatpush3.bf16.msra.mxu1 %v1151_v7 }
  0x7e   :  { %958 = vmatprep.mubr.f32.mxu0 %v794_v49  ;;  %1187 = vmatprep.subr.bf16.mxu1 %v1155_v11 }
  0x7f   :  { %1158 = vmatpush3.bf16.msra.mxu0 %v1155_v11 }
  0x80   :  { %1160 = vmatprep.subr.bf16.mxu0 %v1474_v13 }
  0x81   :  { %959 = vmatmul.mubr.f32.gmra.mrb[2].mxu0 %v795_v51 }
  0x82   :  { %961 = vmatprep.mubr.f32.mxu0 %v798_v52 }
  0x83   :  { %1162 = vmatpush3.bf16.msra.mxu0 %v1474_v13 }
  0x84   :  { %1164 = vmatprep.subr.bf16.mxu0 %v1477_v16 }
  0x85   :  { %962 = vmatmul.mubr.f32.gmra.mrb[4].mxu0 %v799_v54  ;;  %v102_v54 = vld [vmem:[#allocation8 + $0x30] sm:$0xff] }
  0x86   :  { %964 = vmatprep.mubr.f32.mxu0 %v802_v55 }
  0x87   :  { %1166 = vmatpush3.bf16.msra.mxu0 %v1477_v16 }
  0x88   :  { %1168 = vmatprep.subr.bf16.mxu0 %v1481_v19 }
  0x89   :  { %965 = vmatmul.mubr.f32.gmra.mrb[6].mxu0 %v803_v57 }
  0x8a   :  { %967 = vmatprep.mubr.f32.mxu0 %v806_v58 }
  0x8b   :  { %1170 = vmatpush3.bf16.msra.mxu0 %v1481_v19 }
  0x8c   :  { %1172 = vmatprep.subr.bf16.mxu0 %v1485_v22 }
  0x8d   :  { %968 = vmatmul.mubr.f32.gmra.mrb[8].mxu0 %v807_v60 }
  0x8e   :  { %970 = vmatprep.mubr.f32.mxu0 %v810_v61  ;;  %v105_v61 = vld [vmem:[#allocation8 + $0x48] sm:$0xff] }
  0x8f   :  { %1174 = vmatpush3.bf16.msra.mxu0 %v1485_v22 }
  0x90   :  { %1176 = vmatprep.subr.bf16.mxu0 %v1489_v25 }
  0x91   :  { %971 = vmatmul.mubr.f32.gmra.mrb[10].mxu0 %v811_v63 }
  0x92   :  { %973 = vmatprep.mubr.f32.mxu0 %v814_v0 }
  0x93   :  { %1178 = vmatpush3.bf16.msra.mxu0 %v1489_v25 }
  0x94   :  { %1180 = vmatprep.subr.bf16.mxu0 %v1493_v28 }
  0x95   :  { %974 = vmatmul.mubr.f32.gmra.mrb[12].mxu0 %v815_v2 }
  0x96   :  { %976 = vmatprep.mubr.f32.mxu0 %v818_v3 }
  0x97   :  { %1182 = vmatpush3.bf16.msra.mxu0 %v1493_v28 }
  0x99   :  { %977 = vmatmul.mubr.f32.gmra.mrb[14].mxu0 %v819_v4 }
 0x150   :  { %v957_v33 = vpop.f32.mrb[0].mxu0 }
 0x151   :  { %v338_v34 = vadd.f32 %v957_v33, %v97_v31  ;;  %v258_v35 = vpop.f32.mrb[1].mxu0  ;;  %v598_v33 = vld [vmem:[#allocation11 + $0x70] sm:$0xff] }
 0x152   :  { %v337_v36 = vadd.f32 %v258_v35, %v96_v32 }
 0x153   :  { %v392_v43 = vsel %vm390_vm0, 1.0, %v338_v34  ;;  %v599_v34 = vld [vmem:[#allocation11 + $0x78] sm:$0xff] }
 0x154   :  { %v960_v39 = vpop.f32.mrb[2].mxu0  ;;  %v391_v40 = vsel %vm390_vm0, 1.0, %v337_v36  ;;  %v1183_v35 = vpack.c.bf16 %v599_v34, %v598_v33 }
 0x155   :  { %v340_v41 = vadd.f32 %v960_v39, %v99_v37  ;;  %v268_v42 = vpop.f32.mrb[3].mxu0  ;;  %1011 = vmatprep.mubr.f32.mxu1 %v391_v40 }
 0x156   :  { %v339_v44 = vadd.f32 %v268_v42, %v98_v38  ;;  %1012 = vmatmul.mubr.f32.vlgmr.msra.gmra.mrb[0].mxu1 %v392_v43  ;;  %1184 = vmatprep.subr.bf16.mxu0 %v1183_v35 }
 0x157   :  { %1195 = vmatpush3.bf16.msra.mxu1 %v1155_v11  ;;  %v394_v51 = vsel %vm390_vm0, 1.0, %v340_v41  ;;  %1186 = vmatpush3.bf16.msra.mxu0 %v1183_v35 }
 0x158   :  { %v963_v47 = vpop.f32.mrb[4].mxu0  ;;  %v393_v48 = vsel %vm390_vm0, 1.0, %v339_v44  ;;  %1188 = vmatprep.subr.bf16.mxu1 %v1474_v13 }
 0x159   :  { %v342_v49 = vadd.f32 %v963_v47, %v101_v45  ;;  %v278_v50 = vpop.f32.mrb[5].mxu0  ;;  %1014 = vmatprep.mubr.f32.mxu1 %v393_v48 }
 0x15a   :  { %v341_v52 = vadd.f32 %v278_v50, %v100_v46  ;;  %1015 = vmatmul.mubr.f32.gmra.mrb[2].mxu1 %v394_v51 }
 0x15b   :  { %1196 = vmatpush3.bf16.msra.mxu1 %v1474_v13  ;;  %v396_v59 = vsel %vm390_vm0, 1.0, %v342_v49  ;;  %v109_v13 = vld [vmem:[#allocation8 + $0x68] sm:$0xff] }
 0x15c   :  { %v966_v55 = vpop.f32.mrb[6].mxu0  ;;  %v395_v56 = vsel %vm390_vm0, 1.0, %v341_v52  ;;  %1189 = vmatprep.subr.bf16.mxu1 %v1477_v16 }
 0x15d   :  { %v344_v57 = vadd.f32 %v966_v55, %v103_v53  ;;  %v288_v58 = vpop.f32.mrb[7].mxu0  ;;  %1017 = vmatprep.mubr.f32.mxu1 %v395_v56 }
 0x15e   :  { %v343_v60 = vadd.f32 %v288_v58, %v102_v54  ;;  %1018 = vmatmul.mubr.f32.gmra.mrb[4].mxu1 %v396_v59 }
 0x15f   :  { %1197 = vmatpush3.bf16.msra.mxu1 %v1477_v16  ;;  %v398_v3 = vsel %vm390_vm0, 1.0, %v344_v57 }
 0x160   :  { %v969_v63 = vpop.f32.mrb[8].mxu0  ;;  %v397_v0 = vsel %vm390_vm0, 1.0, %v343_v60  ;;  %1190 = vmatprep.subr.bf16.mxu1 %v1481_v19 }
 0x161   :  { %v346_v1 = vadd.f32 %v969_v63, %v105_v61  ;;  %v298_v2 = vpop.f32.mrb[9].mxu0  ;;  %1020 = vmatprep.mubr.f32.mxu1 %v397_v0 }
 0x162   :  { %v345_v4 = vadd.f32 %v298_v2, %v104_v62  ;;  %1021 = vmatmul.mubr.f32.gmra.mrb[6].mxu1 %v398_v3  ;;  %v787_v2 = vld [vmem:[%s1568_s5] ss:$0 sm:$0xff]  ;;  %s1362_s5 = smov [#allocation12]  }
 0x163   :  { %1198 = vmatpush3.bf16.msra.mxu1 %v1481_v19  ;;  %v400_v11 = vsel %vm390_vm0, 1.0, %v346_v1  ;;  %s773_s12 = sshll.u32 %s1362_s5, 4  ;;  %s774_s12 = int_to_ptr.vmem [resolvable:$true] %s773_s12 }
 0x164   :  { %v972_v7 = vpop.f32.mrb[10].mxu0  ;;  %v399_v8 = vsel %vm390_vm0, 1.0, %v345_v4  ;;  %1191 = vmatprep.subr.bf16.mxu1 %v1485_v22  ;;  %s1323_s13 = scalar_lea.vmem %s774_s12, 2048  ;;  %p1328_p13 = scmp.lt.s32.totalorder %s774_s12, %s774_s12 }
 0x165   :  { %v348_v9 = vadd.f32 %v972_v7, %v107_v5  ;;  %v308_v10 = vpop.f32.mrb[11].mxu0  ;;  %1023 = vmatprep.mubr.f32.mxu1 %v399_v8  ;;  %p1324_p12 = scmp.ne.s32.totalorder %s774_s12, %s1323_s13  ;;  %p1329_p0 = scmp.lt.s32.totalorder %s1323_s13, %s1323_s13 }
 0x166   :  { %v347_v12 = vadd.f32 %v308_v10, %v106_v6  ;;  %1024 = vmatmul.mubr.f32.gmra.mrb[8].mxu1 %v400_v11 }
 0x167   :  { %1199 = vmatpush3.bf16.msra.mxu1 %v1485_v22  ;;  %v402_v19 = vsel %vm390_vm0, 1.0, %v348_v9  ;;  %p1330_p1 = por %p1329_p0, %p1328_p13 }
 0x168   :  { %v975_v15 = vpop.f32.mrb[12].mxu0  ;;  %v401_v16 = vsel %vm390_vm0, 1.0, %v347_v12  ;;  %1192 = vmatprep.subr.bf16.mxu1 %v1489_v25 }
 0x169   :  { %v350_v17 = vadd.f32 %v975_v15, %v109_v13  ;;  %v318_v18 = vpop.f32.mrb[13].mxu0  ;;  %1026 = vmatprep.mubr.f32.mxu1 %v401_v16  ;;  %p1331_p2 = pnand %p1330_p1, %p1324_p12 }
 0x16a   :  { %v349_v20 = vadd.f32 %v318_v18, %v108_v14  ;;  %1027 = vmatmul.mubr.f32.gmra.mrb[10].mxu1 %v402_v19 }
 0x16b   :  { %1200 = vmatpush3.bf16.msra.mxu1 %v1489_v25  ;;  %v404_v29 = vsel %vm390_vm0, 1.0, %v350_v17 }
 0x16c   :  { %v978_v24 = vpop.f32.mrb[14].mxu0  ;;  %v403_v22 = vsel %vm390_vm0, 1.0, %v349_v20  ;;  %1193 = vmatprep.subr.bf16.mxu1 %v1493_v28 }
 0x16d   :  { %v352_v26 = vadd.f32 %v978_v24, %v111_v21  ;;  %v328_v27 = vpop.f32.mrb[15].mxu0  ;;  %1029 = vmatprep.mubr.f32.mxu1 %v403_v22 }
 0x16e   :  { %v351_v31 = vadd.f32 %v328_v27, %v110_v23  ;;  %1030 = vmatmul.mubr.f32.gmra.mrb[12].mxu1 %v404_v29 }
 0x16f   :  { %1201 = vmatpush3.bf16.msra.mxu1 %v1493_v28  ;;  %v406_v25 = vsel %vm390_vm0, 1.0, %v352_v26 }
 0x170   :  { %v405_v32 = vsel %vm390_vm0, 1.0, %v351_v31  ;;  %1194 = vmatprep.subr.bf16.mxu1 %v1183_v35 }
 0x171   :  { %1032 = vmatprep.mubr.f32.mxu1 %v405_v32 }
 0x172   :  { %1033 = vmatmul.mubr.f32.gmra.mrb[14].mxu1 %v406_v25 }
 0x173   :  { %1202 = vmatpush3.bf16.msra.mxu1 %v1183_v35 }
 0x229   :  { %v1013_v36 = vpop.f32.mrb[0].mxu1 }
 0x22a   :  { %v489_v37 = vpop.f32.mrb[1].mxu1  ;;  %v569_v39 = vmax.f32 %v1013_v36, 0.0 }
 0x22b   :  { %v568_v38 = vmax.f32 %v489_v37, 0.0 }
 0x22d   :  { %v1016_v28 = vpop.f32.mrb[2].mxu1  ;;  %1067 = vmatprep.mubr.f32.mxu0 %v568_v38 }
 0x22e   :  { %v499_v40 = vpop.f32.mrb[3].mxu1  ;;  %1068 = vmatmul.mubr.f32.vlgmr.msra.gmra.mrb[16].mxu0 %v569_v39  ;;  %v571_v42 = vmax.f32 %v1016_v28, 0.0 }
 0x22f   :  { %v570_v41 = vmax.f32 %v499_v40, 0.0 }
 0x231   :  { %v1019_v30 = vpop.f32.mrb[4].mxu1  ;;  %1070 = vmatprep.mubr.f32.mxu0 %v570_v41 }
 0x232   :  { %v509_v43 = vpop.f32.mrb[5].mxu1  ;;  %1071 = vmatmul.mubr.f32.gmra.mrb[18].mxu0 %v571_v42  ;;  %v573_v45 = vmax.f32 %v1019_v30, 0.0 }
 0x233   :  { %v572_v44 = vmax.f32 %v509_v43, 0.0 }
 0x235   :  { %v1022_v46 = vpop.f32.mrb[6].mxu1  ;;  %1073 = vmatprep.mubr.f32.mxu0 %v572_v44 }
 0x236   :  { %v519_v47 = vpop.f32.mrb[7].mxu1  ;;  %1074 = vmatmul.mubr.f32.gmra.mrb[20].mxu0 %v573_v45  ;;  %v575_v49 = vmax.f32 %v1022_v46, 0.0 }
 0x237   :  { %v574_v48 = vmax.f32 %v519_v47, 0.0 }
 0x239   :  { %v1025_v50 = vpop.f32.mrb[8].mxu1  ;;  %1076 = vmatprep.mubr.f32.mxu0 %v574_v48 }
 0x23a   :  { %v529_v51 = vpop.f32.mrb[9].mxu1  ;;  %1077 = vmatmul.mubr.f32.gmra.mrb[22].mxu0 %v575_v49  ;;  %v577_v53 = vmax.f32 %v1025_v50, 0.0 }
 0x23b   :  { %v576_v52 = vmax.f32 %v529_v51, 0.0 }
 0x23d   :  { %v1028_v54 = vpop.f32.mrb[10].mxu1  ;;  %1079 = vmatprep.mubr.f32.mxu1 %v576_v52 }
 0x23e   :  { %v539_v55 = vpop.f32.mrb[11].mxu1  ;;  %1080 = vmatmul.mubr.f32.vlgmr.msra.gmra.mrb[16].mxu1 %v577_v53  ;;  %v579_v57 = vmax.f32 %v1028_v54, 0.0 }
 0x23f   :  { %v578_v56 = vmax.f32 %v539_v55, 0.0 }
 0x241   :  { %v1031_v58 = vpop.f32.mrb[12].mxu1  ;;  %1082 = vmatprep.mubr.f32.mxu1 %v578_v56 }
 0x242   :  { %v549_v59 = vpop.f32.mrb[13].mxu1  ;;  %1083 = vmatmul.mubr.f32.gmra.mrb[18].mxu1 %v579_v57  ;;  %v581_v61 = vmax.f32 %v1031_v58, 0.0 }
 0x243   :  { %v580_v60 = vmax.f32 %v549_v59, 0.0 }
 0x245   :  { %v1034_v62 = vpop.f32.mrb[14].mxu1  ;;  %1085 = vmatprep.mubr.f32.mxu1 %v580_v60 }
 0x246   :  { %v559_v63 = vpop.f32.mrb[15].mxu1  ;;  %1086 = vmatmul.mubr.f32.gmra.mrb[20].mxu1 %v581_v61  ;;  %v583_v1 = vmax.f32 %v1034_v62, 0.0 }
 0x247   :  { %v582_v0 = vmax.f32 %v559_v63, 0.0 }
 0x249   :  { %1088 = vmatprep.mubr.f32.mxu1 %v582_v0 }
 0x24a   :  { %1089 = vmatmul.mubr.f32.gmra.mrb[22].mxu1 %v583_v1 }
 0x301   :  { %v1069_v3 = vpop.f32.mrb[16].mxu0 }
 0x302   :  { %v679_v4 = vadd.f32 %v1069_v3, %v787_v2  ;;  %v673_v5 = vpop.f32.mrb[17].mxu0 }
 0x303   :  { %v674_v6 = vadd.f32 %v787_v2, %v673_v5 }
 0x304   :  { %753 = vst [vmem:[#allocation12 + $0x8] sm:$0xff] %v679_v4 }
 0x305   :  { %752 = vst [vmem:[#allocation12] sm:$0xff] %v674_v6  ;;  %v1072_v7 = vpop.f32.mrb[18].mxu0 }
 0x306   :  { %v689_v8 = vadd.f32 %v1072_v7, %v787_v2  ;;  %v683_v9 = vpop.f32.mrb[19].mxu0 }
 0x307   :  { %v684_v10 = vadd.f32 %v787_v2, %v683_v9 }
 0x308   :  { %755 = vst [vmem:[#allocation12 + $0x18] sm:$0xff] %v689_v8 }
 0x309   :  { %754 = vst [vmem:[#allocation12 + $0x10] sm:$0xff] %v684_v10  ;;  %v1075_v11 = vpop.f32.mrb[20].mxu0 }
 0x30a   :  { %v699_v12 = vadd.f32 %v1075_v11, %v787_v2  ;;  %v693_v13 = vpop.f32.mrb[21].mxu0 }
 0x30b   :  { %v694_v14 = vadd.f32 %v787_v2, %v693_v13 }
 0x30c   :  { %757 = vst [vmem:[#allocation12 + $0x28] sm:$0xff] %v699_v12 }
 0x30d   :  { %756 = vst [vmem:[#allocation12 + $0x20] sm:$0xff] %v694_v14  ;;  %v1078_v15 = vpop.f32.mrb[22].mxu0 }
 0x30e   :  { %v709_v16 = vadd.f32 %v1078_v15, %v787_v2  ;;  %v703_v17 = vpop.f32.mrb[23].mxu0 }
 0x30f   :  { %v704_v18 = vadd.f32 %v787_v2, %v703_v17 }
 0x310   :  { %759 = vst [vmem:[#allocation12 + $0x38] sm:$0xff] %v709_v16 }
 0x311   :  { %758 = vst [vmem:[#allocation12 + $0x30] sm:$0xff] %v704_v18  ;;  %v1081_v19 = vpop.f32.mrb[16].mxu1 }
 0x312   :  { %v719_v20 = vadd.f32 %v1081_v19, %v787_v2  ;;  %v713_v21 = vpop.f32.mrb[17].mxu1 }
 0x313   :  { %v714_v23 = vadd.f32 %v787_v2, %v713_v21 }
 0x314   :  { %761 = vst [vmem:[#allocation12 + $0x48] sm:$0xff] %v719_v20 }
 0x315   :  { %760 = vst [vmem:[#allocation12 + $0x40] sm:$0xff] %v714_v23  ;;  %v1084_v24 = vpop.f32.mrb[18].mxu1 }
 0x316   :  { %v729_v22 = vadd.f32 %v1084_v24, %v787_v2  ;;  %v723_v26 = vpop.f32.mrb[19].mxu1 }
 0x317   :  { %v724_v27 = vadd.f32 %v787_v2, %v723_v26 }
 0x318   :  { %763 = vst [vmem:[#allocation12 + $0x58] sm:$0xff] %v729_v22 }
 0x319   :  { %762 = vst [vmem:[#allocation12 + $0x50] sm:$0xff] %v724_v27  ;;  %v1087_v29 = vpop.f32.mrb[20].mxu1 }
 0x31a   :  { %v739_v31 = vadd.f32 %v1087_v29, %v787_v2  ;;  %v733_v32 = vpop.f32.mrb[21].mxu1 }
 0x31b   :  { %v734_v25 = vadd.f32 %v787_v2, %v733_v32 }
 0x31c   :  { %765 = vst [vmem:[#allocation12 + $0x68] sm:$0xff] %v739_v31 }
 0x31d   :  { %764 = vst [vmem:[#allocation12 + $0x60] sm:$0xff] %v734_v25  ;;  %v1090_v33 = vpop.f32.mrb[22].mxu1 }
 0x31e   :  { %v749_v34 = vadd.f32 %v1090_v33, %v787_v2  ;;  %v743_v35 = vpop.f32.mrb[23].mxu1 }
 0x31f   :  { %v744_v36 = vadd.f32 %v787_v2, %v743_v35 }
 0x320   :  { %767 = vst [vmem:[#allocation12 + $0x78] sm:$0xff] %v749_v34 }
 0x321   :  { %766 = vst [vmem:[#allocation12 + $0x70] sm:$0xff] %v744_v36 }
 0x322   :  { %1334 = shalt.err (!%p1331_p2)
}
 0x323   :  { %s1335_s17 = scalar_lea.hbm %s1569_s6, 2048 }
 0x324   :  { %p1336_p3 = scmp.ne.s32.totalorder %s1569_s6, %s1335_s17  ;;  %p1339_p4 = scmp.lt.u32.totalorder %s1335_s17, %s1569_s6 }
 0x326   :  { %p1341_p5 = pnand %p1339_p4, %p1336_p3 }
 0x328   :  { %1344 = shalt.err (!%p1341_p5)
}
 0x329   :  { %779 = dma.vmem_to_hbm [thread:$0]  %s774_s12, 2048, %s1569_s6, [#allocation5], %s1354_s7, %s1354_s7, %s1355_s8  }
 0x32a   :  { %1351 = dma.done.wait [#allocation5], 2048  }
 0x32b   :  { %1352 = vsyncadd [#allocation5], 4294965248 }
 0x32c   :  { %783 = vsyncpa [#allocation4], 1 }
 0x32d   :  { %784 = vsyncpa [#allocation7], 1 }
 0x32e   :  { %785 = vsyncpa [#allocation10], 1 }
 0x32f   :  { %786 = vsyncpa [#allocation5], 1 }

</bundles_post_ra>
